<compile_context>
chip_gen: v5e
topology: v5e:2x2
jax: 0.10.0
libtpu: 0.0.40
codegen_flags: <defaults>
</compile_context>

<pallas_src>
import jax
import jax.numpy as jnp
from jax.experimental import pallas as pl
from jax.experimental.pallas import tpu as pltpu


def _pick_l_tile(length: int) -> int:
    """Largest lane-dense tile (multiple of 128) dividing `length`, capped at 1024.

    Falls back to a single full-length tile for small or awkward lengths.
    # TODO(synk): lengths that are large and not a multiple of 128 fall back to a
    # single (possibly VMEM-heavy) tile; a remainder tile would need masking.
    """
    for cand in (1024, 512, 256, 128):
        if length % cand == 0 and length > cand:
            return cand
    return length


def _make_kernel(k_size: int, pad: int, l_tile: int):
    def kernel(xl_ref, x_ref, xr_ref, w_ref, b_ref, o_ref):
        # xl_ref/xr_ref: (1, 1, C_in, hw)   left/right halo columns for this tile
        # x_ref:         (1, C_in, l_tile)  core input tile (unpadded x)
        # w_ref:         (C_total, K*C_in)  fused, tap-major flattened weights (bf16)
        # b_ref:         (C_total, 1)       fused bias (f32)
        # o_ref:         (1, C_total, l_tile)
        x = x_ref[0].astype(jnp.bfloat16)                       # (C_in, l_tile)
        if pad > 0:
            xl = xl_ref[0, 0].astype(jnp.bfloat16)              # (C_in, pad)
            xr = xr_ref[0, 0].astype(jnp.bfloat16)              # (C_in, pad)
            xp = jnp.concatenate([xl, x, xr], axis=1)           # (C_in, l_tile + 2*pad)
        else:
            xp = x
        # im2col: row (k*C_in + ci) of `cols` holds x[ci, t + k] for output position t.
        cols = jnp.concatenate(
            [xp[:, k:k + l_tile] for k in range(k_size)], axis=0
        )                                                       # (K*C_in, l_tile)
        # One MXU matmul over the full fused contraction (K*C_in), f32 accumulation.
        y = jnp.dot(w_ref[...], cols, preferred_element_type=jnp.float32)
        o_ref[0] = (y + b_ref[...]).astype(o_ref.dtype)

    return kernel


def combine_channels_conv1d(x, params, *, padding=1):
    """Applies each Conv1d in `params` to x (NCL) and concatenates channels.

    params: list of (W, b) with W: (C_out, C_in, K), b: (C_out,)
    Returns (N, num_layers * C_out, L).
    """
    n, c_in, length = x.shape
    num_layers = len(params)
    c_out, c_in_w, k_size = params[0][0].shape
    assert c_in_w == c_in, "conv weight C_in must match input channels"
    for w, b in params:
        assert w.shape == params[0][0].shape and b.shape == (c_out,), (
            "all layers must have identical Conv1d shapes")
    assert 2 * padding == k_size - 1, (
        "only 'same' padding (stride=1, dilation=1, pad=(K-1)/2) is supported")

    c_total = num_layers * c_out
    ck = c_in * k_size

    # --- fuse layer parameters (tiny, one-time host-side glue) ---------------
    # Tap-major flattening: W_flat[co, k*C_in + ci] = W[co, ci, k], bf16 for the MXU.
    w_all = jnp.concatenate([w for w, _ in params], axis=0)           # (C_total, C_in, K)
    w_flat = jnp.transpose(w_all, (0, 2, 1)).reshape(c_total, ck)
    w_flat = w_flat.astype(jnp.bfloat16)
    b_col = jnp.concatenate([b for _, b in params], axis=0)[:, None]  # (C_total, 1)
    b_col = b_col.astype(jnp.float32)

    # --- length tiling + halo construction (no full jnp.pad of x in HBM) -----
    l_tile = _pick_l_tile(length)
    n_lt = length // l_tile
    hw = max(padding, 1)                       # halo width (>=1 so block shapes stay valid)
    assert hw <= l_tile, "kernel halo must fit inside one length tile"

    x_r = x.reshape(n, c_in, n_lt, l_tile)     # view; only edge columns are read below
    zeros = jnp.zeros((n, c_in, 1, hw), x.dtype)
    left_halo = jnp.concatenate([zeros, x_r[:, :, :-1, l_tile - hw:]], axis=2)
    right_halo = jnp.concatenate([x_r[:, :, 1:, :hw], zeros], axis=2)
    left_halo = jnp.transpose(left_halo, (0, 2, 1, 3))    # (N, n_lt, C_in, hw)
    right_halo = jnp.transpose(right_halo, (0, 2, 1, 3))  # (N, n_lt, C_in, hw)

    kernel = _make_kernel(k_size, padding, l_tile)
    out_shape = jax.ShapeDtypeStruct((n, c_total, length), x.dtype)
    grid = (n, n_lt)

    return pl.pallas_call(
        kernel,
        out_shape=out_shape,
        grid_spec=pltpu.PrefetchScalarGridSpec(
            num_scalar_prefetch=0,
            grid=grid,
            in_specs=[
                pl.BlockSpec((1, 1, c_in, hw), lambda b_, j: (b_, j, 0, 0)),   # left halo
                pl.BlockSpec((1, c_in, l_tile), lambda b_, j: (b_, 0, j)),     # x core tile
                pl.BlockSpec((1, 1, c_in, hw), lambda b_, j: (b_, j, 0, 0)),   # right halo
                pl.BlockSpec((c_total, ck), lambda b_, j: (0, 0)),             # fused weights
                pl.BlockSpec((c_total, 1), lambda b_, j: (0, 0)),              # fused bias
            ],
            out_specs=pl.BlockSpec((1, c_total, l_tile), lambda b_, j: (b_, 0, j)),
        ),
        compiler_params=pltpu.CompilerParams(
            dimension_semantics=("parallel", "parallel"),
            vmem_limit_bytes=48 * 1024 * 1024,
        ),
    )(left_halo, x, right_halo, w_flat, b_col)


class CombineChannels:
    """JAX mirror of the PyTorch module: layer_list of Conv1d params."""

    def __init__(self, *layer_params, stack_dim=1):
        assert stack_dim == 1, "only stack_dim=1 (channel dim) is supported"
        self.layer_params = list(layer_params)
        self.stack_dim = stack_dim

    def __call__(self, x):
        return combine_channels_conv1d(x, self.layer_params)


def _reference(x, params, padding=1):
    # Reference with the same bf16 rounding of x and W as the kernel (f32 accumulation).
    xb = x.astype(jnp.bfloat16).astype(jnp.float32)
    outs = []
    for w, b in params:
        wb = w.astype(jnp.bfloat16).astype(jnp.float32)
        y = jax.lax.conv_general_dilated(
            xb, wb, window_strides=(1,), padding=((padding, padding),),
            dimension_numbers=("NCH", "OIH", "NCH"),
        )
        outs.append(y + b[None, :, None])
    return jnp.concatenate(outs, axis=1)


if __name__ == "__main__":
    key = jax.random.PRNGKey(0)
    N, C_IN, L = 2, 4, 16
    C_OUT, K = 8, 3
    NUM_LAYERS = 2

    k_x, k_w0, k_b0, k_w1, k_b1 = jax.random.split(key, 5)
    bound = 1.0 / jnp.sqrt(C_IN * K)   # PyTorch Conv1d default init range
    params = [
        (jax.random.uniform(k_w0, (C_OUT, C_IN, K), jnp.float32, -bound, bound),
         jax.random.uniform(k_b0, (C_OUT,), jnp.float32, -bound, bound)),
        (jax.random.uniform(k_w1, (C_OUT, C_IN, K), jnp.float32, -bound, bound),
         jax.random.uniform(k_b1, (C_OUT,), jnp.float32, -bound, bound)),
    ]
    x = jax.random.normal(k_x, (N, C_IN, L), jnp.float32)

    model = CombineChannels(*params, stack_dim=1)
    out = model(x)
    out = jax.block_until_ready(out)

    ref = _reference(x, params)
    assert out.shape == (N, NUM_LAYERS * C_OUT, L), out.shape
    assert jnp.allclose(out, ref, atol=1e-4, rtol=1e-4), "mismatch vs reference conv"

    print("KERNEL_OK")
</pallas_src>

<mosaic_0001>
module attributes {stable_mosaic.version = 11 : i64} {
  func.func @kernel(%arg0: i32, %arg1: i32, %arg2: memref<1x1x4x1xf32, #tpu.memory_space<vmem>>, %arg3: memref<1x4x16xf32, #tpu.memory_space<vmem>>, %arg4: memref<1x1x4x1xf32, #tpu.memory_space<vmem>>, %arg5: memref<16x12xbf16, #tpu.memory_space<vmem>>, %arg6: memref<16x1xf32, #tpu.memory_space<vmem>>, %arg7: memref<1x16x16xf32, #tpu.memory_space<vmem>>) attributes {dimension_semantics = [#tpu.dimension_semantics<parallel>, #tpu.dimension_semantics<parallel>], iteration_bounds = array<i64: 2, 1>, scalar_prefetch = 0 : i64, scratch_operands = 0 : i64, tpu.core_type = #tpu.core_type<tc>, window_params = [{transform_indices = @transform_0, window_bounds = array<i64: 1, 1, 4, 1>}, {transform_indices = @transform_1, window_bounds = array<i64: 1, 4, 16>}, {transform_indices = @transform_2, window_bounds = array<i64: 1, 1, 4, 1>}, {pipeline_mode = #tpu.pipeline_mode<synchronous>, transform_indices = @transform_3, window_bounds = array<i64: 16, 12>}, {pipeline_mode = #tpu.pipeline_mode<synchronous>, transform_indices = @transform_4, window_bounds = array<i64: 16, 1>}, {transform_indices = @transform_5, window_bounds = array<i64: 1, 16, 16>}]} {
    %c0 = arith.constant 0 : index
    %c0_0 = arith.constant 0 : index
    %c0_1 = arith.constant 0 : index
    %0 = vector.load %arg3[%c0, %c0_0, %c0_1] : memref<1x4x16xf32, #tpu.memory_space<vmem>>, vector<1x4x16xf32>
    %1 = vector.shape_cast %0 : vector<1x4x16xf32> to vector<4x16xf32>
    %2 = arith.truncf %1 : vector<4x16xf32> to vector<4x16xbf16>
    %c0_2 = arith.constant 0 : index
    %c0_3 = arith.constant 0 : index
    %c0_4 = arith.constant 0 : index
    %c0_5 = arith.constant 0 : index
    %3 = vector.load %arg2[%c0_2, %c0_3, %c0_4, %c0_5] : memref<1x1x4x1xf32, #tpu.memory_space<vmem>>, vector<1x1x4x1xf32>
    %4 = vector.shape_cast %3 : vector<1x1x4x1xf32> to vector<4x1xf32>
    %5 = arith.truncf %4 : vector<4x1xf32> to vector<4x1xbf16>
    %c0_6 = arith.constant 0 : index
    %c0_7 = arith.constant 0 : index
    %c0_8 = arith.constant 0 : index
    %c0_9 = arith.constant 0 : index
    %6 = vector.load %arg4[%c0_6, %c0_7, %c0_8, %c0_9] : memref<1x1x4x1xf32, #tpu.memory_space<vmem>>, vector<1x1x4x1xf32>
    %7 = vector.shape_cast %6 : vector<1x1x4x1xf32> to vector<4x1xf32>
    %8 = arith.truncf %7 : vector<4x1xf32> to vector<4x1xbf16>
    %9 = tpu.concatenate %5, %2, %8 in 1 : vector<4x1xbf16>, vector<4x16xbf16>, vector<4x1xbf16> -> vector<4x18xbf16>
    %10 = vector.extract_strided_slice %9 {offsets = [0, 0], sizes = [4, 16], strides = [1, 1]} : vector<4x18xbf16> to vector<4x16xbf16>
    %11 = vector.extract_strided_slice %9 {offsets = [0, 1], sizes = [4, 16], strides = [1, 1]} : vector<4x18xbf16> to vector<4x16xbf16>
    %12 = vector.extract_strided_slice %9 {offsets = [0, 2], sizes = [4, 16], strides = [1, 1]} : vector<4x18xbf16> to vector<4x16xbf16>
    %13 = tpu.concatenate %10, %11, %12 in 0 : vector<4x16xbf16>, vector<4x16xbf16>, vector<4x16xbf16> -> vector<12x16xbf16>
    %c0_10 = arith.constant 0 : index
    %c0_11 = arith.constant 0 : index
    %14 = vector.load %arg5[%c0_10, %c0_11] : memref<16x12xbf16, #tpu.memory_space<vmem>>, vector<16x12xbf16>
    %cst = arith.constant dense<0.000000e+00> : vector<16x16xf32>
    %15 = tpu.matmul %14, %13, %cst {dimension_numbers = #tpu.dot_dimension_numbers<[1], [0], [0], [1], [0, 0, 1, 1], [], []>} : vector<16x12xbf16>, vector<12x16xbf16>, vector<16x16xf32> -> vector<16x16xf32>
    %c0_12 = arith.constant 0 : index
    %c0_13 = arith.constant 0 : index
    %16 = vector.load %arg6[%c0_12, %c0_13] : memref<16x1xf32, #tpu.memory_space<vmem>>, vector<16x1xf32>
    %17 = vector.broadcast %16 : vector<16x1xf32> to vector<16x16xf32>
    %18 = arith.addf %15, %17 : vector<16x16xf32>
    %c0_14 = arith.constant 0 : index
    %c0_15 = arith.constant 0 : index
    %c0_16 = arith.constant 0 : index
    %19 = vector.load %arg7[%c0_14, %c0_15, %c0_16] : memref<1x16x16xf32, #tpu.memory_space<vmem>>, vector<1x16x16xf32>
    %20 = vector.shape_cast %19 : vector<1x16x16xf32> to vector<16x16xf32>
    %21 = vector.shape_cast %18 : vector<16x16xf32> to vector<1x16x16xf32>
    tpu.vector_store %arg7[%c0_14, %c0_15, %c0_16], %21 {strides = array<i32>} : memref<1x16x16xf32, #tpu.memory_space<vmem>>, vector<1x16x16xf32>,
    return
  }
  func.func @transform_0(%arg0: i32, %arg1: i32) -> (i32, i32, i32, i32) {
    %c0_i32 = arith.constant 0 : i32
    %c0_i32_0 = arith.constant 0 : i32
    %c0_i32_1 = arith.constant 0 : i32
    return %arg0, %arg1, %c0_i32, %c0_i32_0 : i32, i32, i32, i32
  }
  func.func @transform_1(%arg0: i32, %arg1: i32) -> (i32, i32, i32) {
    %c0_i32 = arith.constant 0 : i32
    %c0_i32_0 = arith.constant 0 : i32
    return %arg0, %c0_i32, %arg1 : i32, i32, i32
  }
  func.func @transform_2(%arg0: i32, %arg1: i32) -> (i32, i32, i32, i32) {
    %c0_i32 = arith.constant 0 : i32
    %c0_i32_0 = arith.constant 0 : i32
    %c0_i32_1 = arith.constant 0 : i32
    return %arg0, %arg1, %c0_i32, %c0_i32_0 : i32, i32, i32, i32
  }
  func.func @transform_3(%arg0: i32, %arg1: i32) -> (i32, i32) {
    %c0_i32 = arith.constant 0 : i32
    %c0_i32_0 = arith.constant 0 : i32
    %c0_i32_1 = arith.constant 0 : i32
    return %c0_i32, %c0_i32_0 : i32, i32
  }
  func.func @transform_4(%arg0: i32, %arg1: i32) -> (i32, i32) {
    %c0_i32 = arith.constant 0 : i32
    %c0_i32_0 = arith.constant 0 : i32
    %c0_i32_1 = arith.constant 0 : i32
    return %c0_i32, %c0_i32_0 : i32, i32
  }
  func.func @transform_5(%arg0: i32, %arg1: i32) -> (i32, i32, i32) {
    %c0_i32 = arith.constant 0 : i32
    %c0_i32_0 = arith.constant 0 : i32
    return %arg0, %c0_i32, %arg1 : i32, i32, i32
  }
}

</mosaic_0001>

<bundles_post_ra>
// kernel: tpu_custom_call.1
= control target key start
LH: loop header
LB: loop body
LE: loop exit
PB: predicated region body
PF: predicated region fallthrough
CT: control target
= control target key end

     0   :  { %10 = vsyncpa [#allocation3], 0  ;;  %s817_s0 = inlined_call_operand.vmem [shape: f32[2,1,4,1], index: 0, kind: input, shape index: {}]   ;;  %s818_s1 = inlined_call_operand.vmem [shape: f32[2,4,16], index: 1, kind: input, shape index: {}]   ;;  %s819_s2 = inlined_call_operand.vmem [shape: f32[2,1,4,1], index: 2, kind: input, shape index: {}]   ;;  %s820_s3 = inlined_call_operand.vmem [shape: bf16[16,12], index: 3, kind: input, shape index: {}]   ;;  %s821_s4 = inlined_call_operand.vmem [shape: f32[16,1], index: 4, kind: input, shape index: {}]   ;;  %s822_s5 = inlined_call_operand.hbm [shape: f32[2,16,16], index: 5, kind: output, shape index: {}]  }
   0x1   :  { %12 = vsyncpa [#allocation3 + $0x1], 0  ;;  %s705_s18 = smov 0   ;;  %s707_s19 = smov 0  }
   0x2   :  { %s709_s20 = smov 0   ;;  %s711_s21 = smov 0  }
   0x3   :  { %s713_s22 = smov 0   ;;  %s715_s23 = smov 0  }
   0x4 LB: > { %s503_s24 = sadd.s32 4294967295, %s666_s23   ;;  %s504_s25 = sadd.s32 4294967294, %s666_s23   ;;  %s666_s23 = sphi %s715_s23, %s18_s23   ;;  %s662_s22 = sphi %s713_s22, %s829_s22   ;;  %s658_s21 = sphi %s711_s21, %s828_s21   ;;  %s654_s20 = sphi %s709_s20, %s827_s20   ;;  %s650_s19 = sphi %s707_s19, %s826_s19   ;;  %s646_s18 = sphi %s705_s18, %s825_s18  }
   0x5   : > { %s30_s26 = sadd.s32 1, %s662_s22  ;;  %s165_s27 = sadd.s32 1, %s654_s20 }
   0x6   : > { %p32_p0 = scmp.ge.s32.totalorder %s30_s26, 2  ;;  %p175_p1 = scmp.ne.s32.totalorder %s654_s20, %s650_s19 }
   0x7   : > { %p176_p2 = scmp.eq.s32.totalorder %s503_s24, 1  ;;  %p181_p3 = scmp.ne.s32.totalorder %s650_s19, %s646_s18 }
   0x8   : > { %s831_s26 = smov (%p32_p0, %s30_s26), 0  ;;  %p182_p5 = scmp.eq.s32.totalorder %s504_s25, 1 }
   0x9   : > { %p745_p4 = por %p176_p2, %p175_p1  ;;  %s160_s29 = ssub.s32 %s662_s22, %s831_s26 }
   0xa   : > { %p507_p6 = scmp.ge.s32.totalorder %s666_s23, 1  ;;  %p163_p7 = scmp.eq.s32.totalorder %s160_s29, 0 }
   0xb   : > { %p752_p8 = por %p182_p5, %p181_p3  ;;  %p236_p9 = scmp.lt.s32.totalorder %s666_s23, 3 }
   0xc   : > { %s758_s6 = scalar_select %p163_p7, %s654_s20, %s165_s27  }
   0xd   : > { %p237_p10 = pnand %p507_p6, %p236_p9 }
   0xe   : > { %p280_p11 = scmp.lt.s32.totalorder (!%p237_p10), %s658_s21, 1  ;;  %s668_s15 = smov (!%p237_p10), 1  }
   0xf   : > { %240 = sbr.rel (%p237_p10) target bundleno = 425 (0x1a9), region = 40  ;;  %s669_s16 = smov (!%p237_p10), 17  }
  0x10   : > { %s670_s27 = smov (!%p237_p10), 127   ;;  %s671_s29 = smov (!%p237_p10), 126  }
  0x11   : > { %s277_s13 = sand.u32 (!%p237_p10), 1, %s650_s19  }
  0x14   : > { %s281_s7 = scalar_select %p280_p11, %s658_s21, 1  ;;  %vm318_vm0 = vcmask 7168   ;;  %vm322_vm1 = vcmask 138240   ;;  %v340_v16 = vld [vmem:[%s821_s4] sm:$0xff]  ;;  %v672_v17 = vmov 0   ;;  %v341_v18 = vld [vmem:[%s821_s4 + $0x8] sm:$0xff] }
  0x15   : > { %586 = vset.pattern.permute.xlu2 %v672_v17  ;;  %587 = vset.pattern.permute.xlu0 %v672_v17  ;;  %vm332_vm2 = vcmask 1041408   ;;  %vm335_vm3 = vcmask 1043456   ;;  %vm361_vm4 = vcmask 1045504   ;;  %v522_v24 = vld [vmem:[%s820_s3] sm:$0xff]  ;;  %vm357_vm5 = vcmask 97280  }
  0x16   : > { %s509_s8 = sshll.u32 %s281_s7, 2  ;;  %344 = vperm.xlu2 %586, %v340_v16   ;;  %vm378_vm6 = vcmask 130048   ;;  %s382_s7 = scalar_lea.sflag [#allocation3], %s277_s13 }
  0x17   : > { %s293_s11 = scalar_lea.vmem %s818_s1, %s509_s8  ;;  %s300_s14 = scalar_lea.vmem %s819_s2, %s509_s8 }
  0x18   : > { %v302_v0 = vld [vmem:[%s293_s11] sm:$0xf]  ;;  %s286_s25 = scalar_lea.vmem %s817_s0, %s509_s8  ;;  %s608_s11 = scalar_lea.hbm %s822_s5, 32 }
  0x19   : > { %v306_v1 = vld [vmem:[%s300_s14] sm:$0xf]  ;;  %v303_v2 = vpack.c.bf16 %v302_v0, %v302_v0  ;;  %s508_s14 = sshll.u32 %s277_s13, 4 }
  0x1a   : > { %v307_v4 = vpack.c.bf16 %v306_v1, %v306_v1  ;;  %v304_v9 = vld [vmem:[%s286_s25] sm:$0xf]  ;;  %s279_s25 = scalar_lea.vmem [#allocation2], %s508_s14 }
  0x1b   : > { %v309_v3 = vunpack.c.l.b16 %v303_v2  ;;  %v305_v10 = vpack.c.bf16 %v304_v9, %v304_v9 }
  0x1c   : > { %v314_v6 = vunpack.c.l.b16 %v307_v4 }
  0x1d   : > { %v310_v5 = vpack.c.b16 %v309_v3, %v309_v3 }
  0x1e   : > { %v315_v7 = vpack.c.b16 %v314_v6, %v314_v6  ;;  %349 = vperm.xlu2 %586, %v341_v18  }
  0x1f   : > { %311 = vrot.lane.b32.xlu0 %v310_v5, %s668_s15  ;;  %s523_s15 = sshll.u32 %s658_s21, 4 }
  0x20   : > { %s394_s24 = scalar_lea.hbm %s822_s5, %s523_s15 }
  0x27   : > { %316 = vrot.lane.b32.xlu0 %v315_v7, %s669_s16 }
  0x70   : > { %v345_v25 = vpop.permute.xlu2 %344 }
  0x78   : > { %v350_v28 = vpop.permute.xlu2 %349 }
  0x91   : > { %v312_v8 = vpop.permute.xlu0 %311 }
  0x92   : > { %v321_v11 = vsel %vm318_vm0, %v305_v10, %v312_v8 }
  0x99   : > { %v317_v12 = vpop.permute.xlu0 %316 }
  0x9a   : > { %v324_v13 = vsel %vm322_vm1, %v321_v11, %v317_v12 }
  0x9b   : > { %v326_v14 = vrot.slane %v324_v13, 6  ;;  %v329_v15 = vrot.slane %v324_v13, 4 }
  0x9d   : > { %327 = vrot.lane.b32.xlu1 %v326_v14, %s670_s27  ;;  %s395_s27 = sshll.u32 %s279_s25, 4  ;;  %s396_s27 = int_to_ptr.vmem [resolvable:$true] %s395_s27 }
  0xa5   : > { %330 = vrot.lane.b32.xlu1 %v329_v15, %s671_s29  ;;  %s397_s29 = sshll.u32 %s394_s24, 4  ;;  %s398_s29 = int_to_ptr.hbm [resolvable:$true] %s397_s29 }
  0xa6   : > { %s602_s21 = sshra.s32 %s398_s29, 4  ;;  %s603_s21 = int_to_ptr.hbm [resolvable:$true] %s602_s21 }
  0xa7   : > { %s604_s9 = scalar_lea.hbm %s603_s21, 16  ;;  %p609_p1 = scmp.lt.s32.totalorder %s603_s21, %s822_s5 }
  0xa8   : > { %p605_p12 = scmp.ne.s32.totalorder %s603_s21, %s604_s9  ;;  %p610_p2 = scmp.lt.s32.totalorder %s608_s11, %s604_s9 }
  0xaa   : > { %p606_p13 = pnand %p605_p12, %p745_p4  ;;  %p611_p3 = por %p610_p2, %p609_p1 }
  0xac   : > { %p607_p0 = pneg %p606_p13 }
  0xae   : > { %p612_p5 = pnand %p611_p3, %p607_p0 }
 0x10f   : > { %v328_v19 = vpop.permute.xlu1 %327 }
 0x110   : > { %v334_v20 = vsel %vm332_vm2, %v324_v13, %v328_v19 }
 0x117   : > { %v331_v21 = vpop.permute.xlu1 %330 }
 0x118   : > { %v337_v22 = vsel %vm335_vm3, %v334_v20, %v331_v21 }
 0x119   : > { %v362_v23 = vsel %vm361_vm4, %v337_v22, 0 }
 0x11a   : > { %371 = vmatpush.bf16.msra.mxu0 %v362_v23 }
 0x11d   : > { %516 = vmatmul.msk.bf16.vlgmr.msra.gmra.mxu0 %vm357_vm5, %v522_v24 }
 0x19a   : > { %v373_v26 = vpop.f32.mrf.mxu0 }
 0x19b   : > { %v374_v27 = vadd.f32 %v373_v26, %v345_v25 }
 0x19d   : > { %379 = vst.msk [vmem:[%s279_s25] sm:$0xff] %vm378_vm6, %v374_v27 }
 0x1a2   : > { %v375_v29 = vpop.f32.mrf.mxu0 }
 0x1a3   : > { %v376_v30 = vadd.f32 %v375_v29, %v350_v28 }
 0x1a5   : > { %380 = vst.msk [vmem:[%s279_s25 + $0x8] sm:$0xff] %vm378_vm6, %v376_v30 }
 0x1a6   : > { %615 = shalt.err (!%p612_p5)
}
 0x1a7   : > { %s673_s13 = smov 128   ;;  %s674_s15 = smov 8  }
 0x1a8   : > { %524 = dma.vmem_to_hbm [thread:$0]  (%p745_p4), %s396_s27, 256, %s398_s29, %s382_s7, %s673_s13, %s673_s13, %s674_s15  }
 0x1a9 PF: > { %p530_p6 = scmp.ge.s32.totalorder %s666_s23, 2  ;;  %s412_s16 = sand.u32 1, %s646_s18  }
 0x1aa   : > { %s413_s17 = scalar_lea.sflag [#allocation3], %s412_s16 }
 0x1ab   : > { %p527_p7 = pnand %p530_p6, %p752_p8 }
 0x1ad   : > { %p528_p9 = pneg %p527_p7 }
 0x1af   : > { %641 = dma.done.wait (%p528_p9), %s413_s17, 256  }
 0x1b0   : > { %643 = vsyncadd (%p528_p9), %s413_s17, 4294967040  ;;  %s18_s23 = sadd.s32 1, %s666_s23   ;;  %s825_s18 = smov %s650_s19 }
 0x1b1   : > { %p15_p10 = scmp.ge.s32.totalorder %s18_s23, 4   ;;  %s826_s19 = smov %s654_s20 }
 0x1b2   : > { %s827_s20 = smov %s758_s6  ;;  %s828_s21 = smov %s662_s22 }
 0x1b3   : > { %s829_s22 = smov %s831_s26  ;;  %17 = sbr.rel (!%p15_p10) target bundleno = 4 (0x4), region = 81 }
 0x1b8   :  { %419 = vsyncpa [#allocation3], 1 }
 0x1b9   :  { %421 = vsyncpa [#allocation3 + $0x1], 1 }

</bundles_post_ra>
